<compile_context>
chip_gen: v6e
topology: v6e:2x2x1
jax: 0.10.0
libtpu: 0.0.40
codegen_flags: <defaults>
</compile_context>

<pallas_src>
import functools

import jax
import jax.numpy as jnp
from jax.experimental import pallas as pl
from jax.experimental.pallas import tpu as pltpu

NEG_SLOPE = 0.01          # PyTorch leaky_relu default negative_slope
LANE = 128
MAX_BATCH_TILE = 32768    # columns per grid step (live VMEM ~12-14 MiB)
MIN_GRID_STEPS = 8        # keep >= 8 steps so v7x's 2 TCs both get grid work
VMEM_LIMIT_BYTES = 48 * 1024 * 1024   # > v5e's 16 MiB default, < v7x's 64 MiB


def _make_kernel(act_dtype):
    """act_dtype: dtype for the post-matmul elementwise work (bf16 on v6e/v7x)."""

    def kernel(x_ref, w1_ref, w2_ref, b2_ref, o_ref):
        # x: (8, TB) bf16, row 7 == 1.0 (bias fold); w1: (32, 8) bf16, col 7 == b1.
        h = jnp.dot(w1_ref[...], x_ref[...],
                    preferred_element_type=jnp.float32)        # (32, TB), bias included
        h = h.astype(act_dtype)
        h = jnp.maximum(h, h * act_dtype(NEG_SLOPE))            # leaky_relu: mul+max

        # dropout(p=0.2): identity at inference time.
        # TODO(synk): training-mode dropout (pltpu.prng_random_bits mask + 1/(1-p)
        # rescale) not emitted; this kernel is inference-only.

        # fc2 (32 -> 1) on the (otherwise idle) MXU, f32 accumulation.
        z = jnp.dot(w2_ref[...], h.astype(jnp.bfloat16),
                    preferred_element_type=jnp.float32)        # (1, TB)
        z = z + b2_ref[...]                                     # (1, 1) broadcast
        o_ref[...] = jax.nn.sigmoid(z).astype(o_ref.dtype)

    return kernel


def _round_up(n, m):
    return ((n + m - 1) // m) * m


def prepare_params(w1, b1, w2, b2):
    """One-time weight prep (do this once, outside the hot path).

    Args (PyTorch-native layouts):
      w1: (hidden, state_num) = fc1.weight,  b1: (hidden,) = fc1.bias
      w2: (1, hidden)         = fc2.weight,  b2: (1,)      = fc2.bias
    Returns (w1_aug bf16 (hidden, state_num+1), w2_row bf16 (1, hidden), b2 f32 (1,1)).
    """
    w1_aug = jnp.concatenate([w1, b1[:, None]], axis=1).astype(jnp.bfloat16)
    w2_row = w2.astype(jnp.bfloat16)
    b2c = b2.reshape(1, 1).astype(jnp.float32)
    return w1_aug, w2_row, b2c


def sl_network_forward_batch_minor(xt, w1_aug, w2_row, b2c, *,
                                   max_batch_tile=MAX_BATCH_TILE,
                                   act_dtype=jnp.bfloat16):
    """Hot-path forward. xt: (state_num+1, Bp) bf16, batch-minor, 128-aligned Bp,
    last feature row == 1.0 (bias fold). Returns (1, Bp) bf16."""
    feat_p, padded_b = xt.shape          # (8, Bp)
    hidden = w1_aug.shape[0]

    # 128-aligned tile, capped at max_batch_tile, but small enough that the
    # grid has >= MIN_GRID_STEPS steps (so both v7x TensorCores get work).
    tile = max(LANE, min(max_batch_tile,
                         _round_up(pl.cdiv(padded_b, MIN_GRID_STEPS), LANE)))
    padded_b2 = _round_up(padded_b, tile)
    if padded_b2 != padded_b:
        xt = jnp.pad(xt, ((0, 0), (0, padded_b2 - padded_b)))
    grid = (padded_b2 // tile,)

    out = pl.pallas_call(
        _make_kernel(act_dtype),
        out_shape=jax.ShapeDtypeStruct((1, padded_b2), jnp.bfloat16),
        grid=grid,
        in_specs=[
            pl.BlockSpec((feat_p, tile), lambda i: (0, i)),     # x tile per step
            pl.BlockSpec((hidden, feat_p), lambda i: (0, 0)),   # w1 (+b1) resident
            pl.BlockSpec((1, hidden), lambda i: (0, 0)),        # w2 resident
            pl.BlockSpec((1, 1), lambda i: (0, 0)),             # b2 resident
        ],
        out_specs=pl.BlockSpec((1, tile), lambda i: (0, i)),
        compiler_params=pltpu.CompilerParams(
            dimension_semantics=("parallel",),       # shard batch grid over 2 TCs (v7x)
            vmem_limit_bytes=VMEM_LIMIT_BYTES,       # clear v5e's 16 MiB scoped default
        ),
    )(xt, w1_aug, w2_row, b2c)

    return out[:, :padded_b]


def sl_network_forward(x, w1, b1, w2, b2, *, max_batch_tile=MAX_BATCH_TILE,
                       act_dtype=jnp.bfloat16):
    """PyTorch-layout compatibility wrapper.

    NOTE: the transpose/pad/cast here and the trailing slice/transpose are
    extra HBM passes outside the kernel; performance-sensitive callers should
    keep data batch-minor and call `sl_network_forward_batch_minor` directly.

    x: (B, state_num) f32 -> returns (B, 1) f32.
    """
    B, _ = x.shape
    padded_b = _round_up(max(B, 1), LANE)

    # Append a constant-1 feature (bias fold), go batch-minor bf16, pad batch.
    xb = jnp.concatenate([x, jnp.ones((B, 1), x.dtype)], axis=1)      # (B, 8)
    xt = jnp.pad(xb.T.astype(jnp.bfloat16), ((0, 0), (0, padded_b - B)))

    w1_aug, w2_row, b2c = prepare_params(w1, b1, w2, b2)
    out = sl_network_forward_batch_minor(xt, w1_aug, w2_row, b2c,
                                         max_batch_tile=max_batch_tile,
                                         act_dtype=act_dtype)
    # Padded batch lanes hold garbage (zero input + no bias fold); slice them off.
    return out[:, :B].T.astype(jnp.float32)                           # (B, 1)


def init_params(key, state_num=7, hidden_units_num=32):
    """Deterministic init mimicking torch.nn.Linear (U(-1/sqrt(fan_in), +1/sqrt(fan_in)))."""
    k1, k2, k3, k4 = jax.random.split(key, 4)
    bound1 = 1.0 / jnp.sqrt(state_num)
    bound2 = 1.0 / jnp.sqrt(hidden_units_num)
    w1 = jax.random.uniform(k1, (hidden_units_num, state_num),
                            minval=-bound1, maxval=bound1, dtype=jnp.float32)
    b1 = jax.random.uniform(k2, (hidden_units_num,),
                            minval=-bound1, maxval=bound1, dtype=jnp.float32)
    w2 = jax.random.uniform(k3, (1, hidden_units_num),
                            minval=-bound2, maxval=bound2, dtype=jnp.float32)
    b2 = jax.random.uniform(k4, (1,),
                            minval=-bound2, maxval=bound2, dtype=jnp.float32)
    return w1, b1, w2, b2


if __name__ == "__main__":
    key = jax.random.PRNGKey(0)
    k_x, k_p = jax.random.split(key)

    state_num, hidden_units_num, batch = 7, 32, 6
    x = jax.random.uniform(k_x, (batch, state_num), dtype=jnp.float32)
    w1, b1, w2, b2 = init_params(k_p, state_num, hidden_units_num)

    out = sl_network_forward(x, w1, b1, w2, b2)
    out = jax.block_until_ready(out)

    # Pure-JAX f32 reference of the same forward pass (dropout = identity in eval).
    h = x @ w1.T + b1
    h = jnp.where(h > 0, h, NEG_SLOPE * h)
    ref = jax.nn.sigmoid(h @ w2.T + b2)

    assert out.shape == (batch, 1)
    # Kernel uses bf16 matmul inputs / bf16 activations -> loose tolerance vs f32 ref.
    assert jnp.allclose(out, ref, atol=2e-2, rtol=2e-2), \
        float(jnp.max(jnp.abs(out - ref)))

    print("KERNEL_OK")
</pallas_src>

<mosaic_0001>
module attributes {stable_mosaic.version = 11 : i64} {
  func.func @kernel(%arg0: i32, %arg1: memref<8x128xbf16, #tpu.memory_space<vmem>>, %arg2: memref<32x8xbf16, #tpu.memory_space<vmem>>, %arg3: memref<1x32xbf16, #tpu.memory_space<vmem>>, %arg4: memref<1x1xf32, #tpu.memory_space<vmem>>, %arg5: memref<1x128xbf16, #tpu.memory_space<vmem>>) attributes {dimension_semantics = [#tpu.dimension_semantics<parallel>], iteration_bounds = array<i64: 1>, scalar_prefetch = 0 : i64, scratch_operands = 0 : i64, tpu.core_type = #tpu.core_type<tc>, window_params = [{transform_indices = @transform_0, window_bounds = array<i64: 8, 128>}, {pipeline_mode = #tpu.pipeline_mode<synchronous>, transform_indices = @transform_1, window_bounds = array<i64: 32, 8>}, {pipeline_mode = #tpu.pipeline_mode<synchronous>, transform_indices = @transform_2, window_bounds = array<i64: 1, 32>}, {pipeline_mode = #tpu.pipeline_mode<synchronous>, transform_indices = @transform_3, window_bounds = array<i64: 1, 1>}, {transform_indices = @transform_4, window_bounds = array<i64: 1, 128>}]} {
    %c0 = arith.constant 0 : index
    %c0_0 = arith.constant 0 : index
    %0 = vector.load %arg2[%c0, %c0_0] : memref<32x8xbf16, #tpu.memory_space<vmem>>, vector<32x8xbf16>
    %c0_1 = arith.constant 0 : index
    %c0_2 = arith.constant 0 : index
    %1 = vector.load %arg1[%c0_1, %c0_2] : memref<8x128xbf16, #tpu.memory_space<vmem>>, vector<8x128xbf16>
    %cst = arith.constant dense<0.000000e+00> : vector<32x128xf32>
    %2 = tpu.matmul %0, %1, %cst {dimension_numbers = #tpu.dot_dimension_numbers<[1], [0], [0], [1], [0, 0, 1, 1], [], []>} : vector<32x8xbf16>, vector<8x128xbf16>, vector<32x128xf32> -> vector<32x128xf32>
    %3 = arith.truncf %2 : vector<32x128xf32> to vector<32x128xbf16>
    %cst_3 = arith.constant 1.000980e-02 : bf16
    %4 = vector.broadcast %cst_3 : bf16 to vector<32x128xbf16>
    %5 = arith.mulf %3, %4 : vector<32x128xbf16>
    %6 = arith.maximumf %3, %5 : vector<32x128xbf16>
    %c0_4 = arith.constant 0 : index
    %c0_5 = arith.constant 0 : index
    %7 = vector.load %arg3[%c0_4, %c0_5] : memref<1x32xbf16, #tpu.memory_space<vmem>>, vector<1x32xbf16>
    %cst_6 = arith.constant dense<0.000000e+00> : vector<1x128xf32>
    %8 = tpu.matmul %7, %6, %cst_6 {dimension_numbers = #tpu.dot_dimension_numbers<[1], [0], [0], [1], [0, 0, 1, 1], [], []>} : vector<1x32xbf16>, vector<32x128xbf16>, vector<1x128xf32> -> vector<1x128xf32>
    %c0_7 = arith.constant 0 : index
    %c0_8 = arith.constant 0 : index
    %9 = vector.load %arg4[%c0_7, %c0_8] : memref<1x1xf32, #tpu.memory_space<vmem>>, vector<1x1xf32>
    %10 = vector.broadcast %9 : vector<1x1xf32> to vector<1x128xf32>
    %11 = arith.addf %8, %10 : vector<1x128xf32>
    %12 = arith.negf %11 : vector<1x128xf32>
    %13 = math.exp %12 : vector<1x128xf32>
    %cst_9 = arith.constant 1.000000e+00 : f32
    %14 = vector.broadcast %cst_9 : f32 to vector<1x128xf32>
    %15 = arith.addf %14, %13 : vector<1x128xf32>
    %16 = arith.divf %14, %15 : vector<1x128xf32>
    %17 = arith.truncf %16 : vector<1x128xf32> to vector<1x128xbf16>
    %c0_10 = arith.constant 0 : index
    %c0_11 = arith.constant 0 : index
    %18 = vector.load %arg5[%c0_10, %c0_11] : memref<1x128xbf16, #tpu.memory_space<vmem>>, vector<1x128xbf16>
    tpu.vector_store %arg5[%c0_10, %c0_11], %17 {strides = array<i32>} : memref<1x128xbf16, #tpu.memory_space<vmem>>, vector<1x128xbf16>,
    return
  }
  func.func @transform_0(%arg0: i32) -> (i32, i32) {
    %c0_i32 = arith.constant 0 : i32
    %c0_i32_0 = arith.constant 0 : i32
    return %c0_i32, %arg0 : i32, i32
  }
  func.func @transform_1(%arg0: i32) -> (i32, i32) {
    %c0_i32 = arith.constant 0 : i32
    %c0_i32_0 = arith.constant 0 : i32
    %c0_i32_1 = arith.constant 0 : i32
    return %c0_i32, %c0_i32_0 : i32, i32
  }
  func.func @transform_2(%arg0: i32) -> (i32, i32) {
    %c0_i32 = arith.constant 0 : i32
    %c0_i32_0 = arith.constant 0 : i32
    %c0_i32_1 = arith.constant 0 : i32
    return %c0_i32, %c0_i32_0 : i32, i32
  }
  func.func @transform_3(%arg0: i32) -> (i32, i32) {
    %c0_i32 = arith.constant 0 : i32
    %c0_i32_0 = arith.constant 0 : i32
    %c0_i32_1 = arith.constant 0 : i32
    return %c0_i32, %c0_i32_0 : i32, i32
  }
  func.func @transform_4(%arg0: i32) -> (i32, i32) {
    %c0_i32 = arith.constant 0 : i32
    %c0_i32_0 = arith.constant 0 : i32
    return %c0_i32, %arg0 : i32, i32
  }
}

</mosaic_0001>

<bundles_post_ra>
// kernel: tpu_custom_call.1
= control target key start
LH: loop header
LB: loop body
LE: loop exit
PB: predicated region body
PF: predicated region fallthrough
CT: control target
= control target key end

     0   :  { %s292_s0 = inlined_call_operand.vmem [shape: bf16[8,128], index: 0, kind: input, shape index: {}]   ;;  %s293_s1 = inlined_call_operand.vmem [shape: bf16[32,8], index: 1, kind: input, shape index: {}]   ;;  %s294_s2 = inlined_call_operand.vmem [shape: bf16[1,32], index: 2, kind: input, shape index: {}]   ;;  %s295_s3 = inlined_call_operand.<no memory space> [shape: f32[1,1], index: 3, kind: input, shape index: {}]   ;;  %s296_s4 = inlined_call_operand.hbm [shape: bf16[1,128], index: 4, kind: output, shape index: {}]  }
   0x1   :  { %v9_v0 = vstv %s295_s3 }
   0x2   :  { %10 = vst [vmem:[#allocation2] sm:$0x1] %v9_v0 }
   0x3   :  { %v26_v1 = vld [vmem:[%s292_s0] sm:$0xf]  ;;  %vm44_vm0 = vcmask 1043456   ;;  %vm37_vm1 = vcmask 64512   ;;  %v218_v4 = vld [vmem:[%s293_s1 + $0x8] sm:$0xff]  }
   0x4   :  { %v217_v2 = vld [vmem:[%s293_s1] sm:$0xff]   ;;  %211 = vmatprep.subr.msk.bf16.mxu0 %vm44_vm0, %v26_v1  ;;  %v46_v3 = vsel %vm44_vm0, %v26_v1, 0 }
   0x5   :  { %198 = vmatpush3.bf16.msra.mxu0 %v46_v3  ;;  %199 = vmatprep.mubr.msk.bf16.mxu0 %vm37_vm1, %v217_v2 }
   0x6   :  { %11 = vsyncpa [#allocation4], 0  ;;  %v245_v5 = vmov 0.0   ;;  %vm246_vm2 = vmmov 0   ;;  %v247_v7 = vmov 0   ;;  %vm114_vm3 = vcmask 261120  }
   0x7   :  { %203 = vmatprep.subr.bf16.mxu1 %v245_v5  ;;  %207 = vmatprep.mubr.msk.bf16.mxu1 %vm246_vm2, %v245_v5  ;;  %v103_v18 = vld [vmem:[%s294_s2] sm:$0x1]  ;;  %v110_v19 = vlaneseq  ;;  %vm165_vm4 = vcmask 1040384   ;;  %vm166_vm5 = vsmask.f32 256  ;;  %s248_s2 = smov [#allocation3]  }
   0x8   :  { %200 = vmatmul.mubr.msk.bf16.vlgmr.msra.gmra.mxu0 %vm37_vm1, %v218_v4  ;;  %216 = vset.pattern.permute.xlu0 %v247_v7  ;;  %s177_s3 = sshll.u32 %s248_s2, 4  ;;  %vm167_vm6 = vmand %vm165_vm4, %vm166_vm5  ;;  %v168_v33 = vld [vmem:[#allocation3] sm:$0x1]  ;;  %s178_s3 = int_to_ptr.vmem [resolvable:$true] %s177_s3 }
   0x9   :  { %v104_v6 = vld [vmem:[#allocation2] sm:$0x1]  ;;  %v111_v20 = vshrl.u32 %v110_v19, 7  ;;  %s223_s23 = scalar_lea.vmem %s178_s3, 16  ;;  %s227_s24 = scalar_lea.vmem %s178_s3, 32 }
   0xa   :  { %107 = vperm.xlu0 %216, %v104_v6   ;;  %p224_p0 = scmp.ne.s32.totalorder %s178_s3, %s223_s23  ;;  %p228_p1 = scmp.lt.s32.totalorder %s178_s3, %s178_s3 }
   0xb   :  { %v112_v21 = vsub.s32 0, %v111_v20  ;;  %p229_p2 = scmp.lt.s32.totalorder %s227_s24, %s223_s23 }
   0xd   :  { %p230_p3 = por %p229_p2, %p228_p1 }
   0xf   :  { %p231_p4 = pnand %p230_p3, %p224_p0 }
  0x85   :  { %v108_v22 = vpop.permute.xlu0 %107 }
  0x86   :  { %v113_v23 = vrot.slane %v108_v22, %v112_v21 }
  0xc8   :  { %v201_v8 = vpop.f32.mrf.mxu0 }
  0xca   :  { %v82_v9 = vpop.f32.mrf.mxu0 }
  0xcc   :  { %v202_v10 = vpop.f32.mrf.mxu0 }
  0xcd   :  { %v98_v11 = vpack.c.bf16 %v202_v10, %v201_v8 }
  0xce   :  { %v85_v12 = vpop.f32.mrf.mxu0 }
  0xcf   :  { %v100_v13 = vmul.bf16 1009007652, %v98_v11  ;;  %v97_v14 = vpack.c.bf16 %v85_v12, %v82_v9 }
  0xd1   :  { %v99_v15 = vmul.bf16 1009007652, %v97_v14  ;;  %v102_v16 = vmax.bf16 %v100_v13, %v98_v11 }
  0xd3   :  { %204 = vmatpush3.bf16.msra.mxu1 %v102_v16  ;;  %v101_v17 = vmax.bf16 %v99_v15, %v97_v14 }
  0xd4   :  { %205 = vmatprep.subr.bf16.mxu1 %v245_v5 }
  0xd7   :  { %206 = vmatpush3.bf16.msra.mxu1 %v101_v17 }
  0xda   :  { %208 = vmatmul.mubr.msk.bf16.vlgmr.msra.gmra.mxu1 %vm114_vm3, %v103_v18 }
 0x19a   :  { %v152_v24 = vpop.f32.mrf.mxu1 }
 0x19b   :  { %v153_v25 = vadd.f32 %v152_v24, %v113_v23 }
 0x19c   :  { %v209_v26 = vpop.f32.mrf.mxu1 }
 0x19d   :  { %v190_v27 = vmul.f32 -1.442695, %v153_v25 }
 0x19e   :  { %v155_v28 = vpop.f32.mrf.mxu1 }
 0x19f   :  { %219 = vpow2.f32 %v190_v27 }
 0x1a0   :  { %v210_v29 = vpop.f32.mrf.mxu1 }
 0x1ac   :  { %v220_v30 = vpop.eup %219 }
 0x1ad   :  { %v161_v31 = vadd.f32 1.0, %v220_v30 }
 0x1af   :  { %221 = vrcp.f32 %v161_v31 }
 0x1bc   :  { %v222_v32 = vpop.eup %221 }
 0x1bd   :  { %v164_v34 = vpack.c.bf16 %v222_v32, %v222_v32 }
 0x1bf   :  { %v169_v35 = vsel %vm167_vm6, %v164_v34, %v168_v33 }
 0x1c0   :  { %170 = vst [vmem:[#allocation3] sm:$0x1] %v169_v35 }
 0x1c1   :  { %234 = shalt.err (!%p231_p4)
}
 0x1c2   :  { %180 = dma.vmem_to_hbm [thread:$0]  %s178_s3, 16, %s296_s4, [#allocation4]  }
 0x1c3   :  { %243 = dma.done.wait [#allocation4], 16  }
 0x1c4   :  { %244 = vsyncadd [#allocation4], 4294967280 }
 0x1c5   :  { %184 = vsyncpa [#allocation4], 1 }

</bundles_post_ra>
